<compile_context>
chip_gen: v6e
topology: v6e:2x2x1
jax: 0.10.0
libtpu: 0.0.40
codegen_flags: <defaults>
</compile_context>

<pallas_src>
import functools

import jax
import jax.numpy as jnp
from jax.experimental import pallas as pl
from jax.experimental.pallas import tpu as pltpu

EPS = 1e-5


def _round_up(a, b):
    return ((a + b - 1) // b) * b


def _sym_layernorm_kernel(x_ref, seg_ref, segt_ref, w_ref, b_ref, o_ref, *, inv_d):
    """Normalize each head's channel segment of a lane-dense (TM, C) tile."""
    x = x_ref[...].astype(jnp.float32)           # (TM, C)
    seg = seg_ref[...]                           # (C, H)  0/1 channel->head map
    segt = segt_ref[...]                         # (H, C)  its transpose

    hp = jax.lax.Precision.HIGHEST               # keep f32 accuracy through the MXU

    # Per-head mean via MXU, broadcast back to channels via the transpose.
    mean_h = jnp.dot(x, seg, precision=hp, preferred_element_type=jnp.float32) * inv_d  # (TM, H)
    mean = jnp.dot(mean_h, segt, precision=hp, preferred_element_type=jnp.float32)      # (TM, C)
    xc = x - mean

    # Per-head biased variance (two-pass, centered -> no cancellation), then rsqrt (EUP).
    var_h = jnp.dot(xc * xc, seg, precision=hp, preferred_element_type=jnp.float32) * inv_d  # (TM, H)
    inv_h = jax.lax.rsqrt(var_h + EPS)                                                       # (TM, H)
    inv = jnp.dot(inv_h, segt, precision=hp, preferred_element_type=jnp.float32)             # (TM, C)

    y = xc * inv
    y = y * w_ref[...] + b_ref[...]              # lane-aligned per-channel scale/bias
    o_ref[...] = y.astype(o_ref.dtype)


def symbolic_layer_norm(x, channel_weights, channel_biases, n_head, *, tm_target=512):
    """x: (B, T, C) with C = n_head * head_dim. Matches SymbolicLayerNorm.forward."""
    B, T, C = x.shape
    assert C % n_head == 0
    head_dim = C // n_head
    N = B * T
    itemsize = jnp.dtype(x.dtype).itemsize

    xr = x.reshape(N, C)

    # Per-channel scale / bias, lane-dense (1, C).
    w = jnp.repeat(channel_weights.astype(jnp.float32), head_dim).reshape(1, C)
    if channel_biases is None:
        b = jnp.zeros((1, C), jnp.float32)
    else:
        b = jnp.repeat(channel_biases.astype(jnp.float32), head_dim).reshape(1, C)

    # Constant 0/1 segment matrix mapping channels -> heads, and its transpose.
    head_of_channel = jnp.arange(C, dtype=jnp.int32) // head_dim
    seg = (head_of_channel[:, None]
           == jnp.arange(n_head, dtype=jnp.int32)[None, :]).astype(jnp.float32)   # (C, H)
    segt = seg.T                                                                   # (H, C)

    # ---- Row tiling --------------------------------------------------------
    # Sublane quantum: 8 rows for 4-byte dtypes, 16 for 2-byte, 32 for 1-byte.
    row_q = max(8, 32 // max(itemsize, 1))
    # Cap TM so ~(2x in + 2x out double-buffered I/O + f32 temporaries) stays
    # comfortably inside v7x's 64 MiB physical VMEM.
    bytes_per_row = C * (4 * itemsize + 8 * 4)
    tm_cap = max(row_q, (((44 << 20) // bytes_per_row) // row_q) * row_q)
    tm_target = max(row_q, min(tm_target, tm_cap))

    n_q = _round_up(N, row_q)
    num_blocks = max(1, (n_q + tm_target - 1) // tm_target)
    TM = _round_up((n_q + num_blocks - 1) // num_blocks, row_q)
    n_pad = TM * num_blocks
    if n_pad != N:
        xr = jnp.pad(xr, ((0, n_pad - N), (0, 0)))   # padded rows are computed then dropped

    vmem_needed = 4 * TM * C * itemsize + 8 * TM * C * 4 + (2 << 20)
    vmem_limit = int(max(32 << 20, vmem_needed))

    kernel = functools.partial(_sym_layernorm_kernel, inv_d=1.0 / head_dim)

    out = pl.pallas_call(
        kernel,
        out_shape=jax.ShapeDtypeStruct((n_pad, C), x.dtype),
        grid=(num_blocks,),
        in_specs=[
            pl.BlockSpec((TM, C), lambda i: (i, 0)),
            pl.BlockSpec((C, n_head), lambda i: (0, 0)),
            pl.BlockSpec((n_head, C), lambda i: (0, 0)),
            pl.BlockSpec((1, C), lambda i: (0, 0)),
            pl.BlockSpec((1, C), lambda i: (0, 0)),
        ],
        out_specs=pl.BlockSpec((TM, C), lambda i: (i, 0)),
        compiler_params=pltpu.CompilerParams(
            dimension_semantics=("parallel",),
            vmem_limit_bytes=vmem_limit,
        ),
    )(xr, seg, segt, w, b)

    if n_pad != N:
        out = out[:N]
    return out.reshape(B, T, C)


def _reference(x, w, b, n_head):
    B, T, C = x.shape
    d = C // n_head
    xh = x.reshape(B, T, n_head, d).astype(jnp.float32)
    mean = jnp.mean(xh, axis=-1, keepdims=True)
    var = jnp.mean((xh - mean) ** 2, axis=-1, keepdims=True)
    y = (xh - mean) * jax.lax.rsqrt(var + EPS)
    y = y * w[None, None, :, None] + b[None, None, :, None]
    return y.reshape(B, T, C).astype(x.dtype)


if __name__ == "__main__":
    B, T = 2, 8
    n_embd, n_head = 32, 4

    key = jax.random.PRNGKey(0)
    k_x, k_x2, k_w2, k_b2 = jax.random.split(key, 4)
    x = jax.random.normal(k_x, (B, T, n_embd), dtype=jnp.float32)

    # Deterministic parameter init, matching the module's __init__:
    # channel_weights = ones(n_head), channel_biases = zeros(n_head).
    channel_weights = jnp.ones((n_head,), jnp.float32)
    channel_biases = jnp.zeros((n_head,), jnp.float32)

    out = symbolic_layer_norm(x, channel_weights, channel_biases, n_head)
    out = jax.block_until_ready(out)

    ref = _reference(x, channel_weights, channel_biases, n_head)
    assert out.shape == (B, T, n_embd)
    assert jnp.allclose(out, ref, atol=1e-4, rtol=1e-4)

    # Exercise the row-padding path (N = B*T not a multiple of the sublane
    # quantum) with non-trivial per-head scale / bias.
    x2 = jax.random.normal(k_x2, (3, 5, n_embd), dtype=jnp.float32)
    w2 = jax.random.normal(k_w2, (n_head,), dtype=jnp.float32)
    b2 = jax.random.normal(k_b2, (n_head,), dtype=jnp.float32)
    out2 = jax.block_until_ready(symbolic_layer_norm(x2, w2, b2, n_head))
    ref2 = _reference(x2, w2, b2, n_head)
    assert jnp.allclose(out2, ref2, atol=1e-4, rtol=1e-4)

    print("KERNEL_OK")
</pallas_src>

<mosaic_0001>
module attributes {stable_mosaic.version = 11 : i64} {
  func.func @_sym_layernorm_kernel(%arg0: i32, %arg1: memref<16x32xf32, #tpu.memory_space<vmem>>, %arg2: memref<32x4xf32, #tpu.memory_space<vmem>>, %arg3: memref<4x32xf32, #tpu.memory_space<vmem>>, %arg4: memref<1x32xf32, #tpu.memory_space<vmem>>, %arg5: memref<1x32xf32, #tpu.memory_space<vmem>>, %arg6: memref<16x32xf32, #tpu.memory_space<vmem>>) attributes {dimension_semantics = [#tpu.dimension_semantics<parallel>], iteration_bounds = array<i64: 1>, scalar_prefetch = 0 : i64, scratch_operands = 0 : i64, tpu.core_type = #tpu.core_type<tc>, window_params = [{transform_indices = @transform_0, window_bounds = array<i64: 16, 32>}, {pipeline_mode = #tpu.pipeline_mode<synchronous>, transform_indices = @transform_1, window_bounds = array<i64: 32, 4>}, {pipeline_mode = #tpu.pipeline_mode<synchronous>, transform_indices = @transform_2, window_bounds = array<i64: 4, 32>}, {pipeline_mode = #tpu.pipeline_mode<synchronous>, transform_indices = @transform_3, window_bounds = array<i64: 1, 32>}, {pipeline_mode = #tpu.pipeline_mode<synchronous>, transform_indices = @transform_4, window_bounds = array<i64: 1, 32>}, {transform_indices = @transform_5, window_bounds = array<i64: 16, 32>}]} {
    %c0 = arith.constant 0 : index
    %c0_0 = arith.constant 0 : index
    %0 = vector.load %arg1[%c0, %c0_0] : memref<16x32xf32, #tpu.memory_space<vmem>>, vector<16x32xf32>
    %c0_1 = arith.constant 0 : index
    %c0_2 = arith.constant 0 : index
    %1 = vector.load %arg2[%c0_1, %c0_2] : memref<32x4xf32, #tpu.memory_space<vmem>>, vector<32x4xf32>
    %c0_3 = arith.constant 0 : index
    %c0_4 = arith.constant 0 : index
    %2 = vector.load %arg3[%c0_3, %c0_4] : memref<4x32xf32, #tpu.memory_space<vmem>>, vector<4x32xf32>
    %cst = arith.constant dense<0.000000e+00> : vector<16x4xf32>
    %3 = tpu.matmul %0, %1, %cst {dimension_numbers = #tpu.dot_dimension_numbers<[1], [0], [0], [1], [0, 0, 1, 1], [], []>, precision = #tpu.contract_precision<fp32>} : vector<16x32xf32>, vector<32x4xf32>, vector<16x4xf32> -> vector<16x4xf32>
    %cst_5 = arith.constant 1.250000e-01 : f32
    %4 = vector.broadcast %cst_5 : f32 to vector<16x4xf32>
    %5 = arith.mulf %3, %4 : vector<16x4xf32>
    %cst_6 = arith.constant dense<0.000000e+00> : vector<16x32xf32>
    %6 = tpu.matmul %5, %2, %cst_6 {dimension_numbers = #tpu.dot_dimension_numbers<[1], [0], [0], [1], [0, 0, 1, 1], [], []>, precision = #tpu.contract_precision<fp32>} : vector<16x4xf32>, vector<4x32xf32>, vector<16x32xf32> -> vector<16x32xf32>
    %7 = arith.subf %0, %6 : vector<16x32xf32>
    %8 = arith.mulf %7, %7 : vector<16x32xf32>
    %cst_7 = arith.constant dense<0.000000e+00> : vector<16x4xf32>
    %9 = tpu.matmul %8, %1, %cst_7 {dimension_numbers = #tpu.dot_dimension_numbers<[1], [0], [0], [1], [0, 0, 1, 1], [], []>, precision = #tpu.contract_precision<fp32>} : vector<16x32xf32>, vector<32x4xf32>, vector<16x4xf32> -> vector<16x4xf32>
    %cst_8 = arith.constant 1.250000e-01 : f32
    %10 = vector.broadcast %cst_8 : f32 to vector<16x4xf32>
    %11 = arith.mulf %9, %10 : vector<16x4xf32>
    %cst_9 = arith.constant 9.99999974E-6 : f32
    %12 = vector.broadcast %cst_9 : f32 to vector<16x4xf32>
    %13 = arith.addf %11, %12 : vector<16x4xf32>
    %14 = math.rsqrt %13 : vector<16x4xf32>
    %cst_10 = arith.constant dense<0.000000e+00> : vector<16x32xf32>
    %15 = tpu.matmul %14, %2, %cst_10 {dimension_numbers = #tpu.dot_dimension_numbers<[1], [0], [0], [1], [0, 0, 1, 1], [], []>, precision = #tpu.contract_precision<fp32>} : vector<16x4xf32>, vector<4x32xf32>, vector<16x32xf32> -> vector<16x32xf32>
    %16 = arith.mulf %7, %15 : vector<16x32xf32>
    %c0_11 = arith.constant 0 : index
    %c0_12 = arith.constant 0 : index
    %17 = vector.load %arg4[%c0_11, %c0_12] : memref<1x32xf32, #tpu.memory_space<vmem>>, vector<1x32xf32>
    %18 = vector.broadcast %17 : vector<1x32xf32> to vector<16x32xf32>
    %19 = arith.mulf %16, %18 : vector<16x32xf32>
    %c0_13 = arith.constant 0 : index
    %c0_14 = arith.constant 0 : index
    %20 = vector.load %arg5[%c0_13, %c0_14] : memref<1x32xf32, #tpu.memory_space<vmem>>, vector<1x32xf32>
    %21 = vector.broadcast %20 : vector<1x32xf32> to vector<16x32xf32>
    %22 = arith.addf %19, %21 : vector<16x32xf32>
    %c0_15 = arith.constant 0 : index
    %c0_16 = arith.constant 0 : index
    %23 = vector.load %arg6[%c0_15, %c0_16] : memref<16x32xf32, #tpu.memory_space<vmem>>, vector<16x32xf32>
    tpu.vector_store %arg6[%c0_15, %c0_16], %22 {strides = array<i32>} : memref<16x32xf32, #tpu.memory_space<vmem>>, vector<16x32xf32>,
    return
  }
  func.func @transform_0(%arg0: i32) -> (i32, i32) {
    %c0_i32 = arith.constant 0 : i32
    %c0_i32_0 = arith.constant 0 : i32
    return %arg0, %c0_i32 : i32, i32
  }
  func.func @transform_1(%arg0: i32) -> (i32, i32) {
    %c0_i32 = arith.constant 0 : i32
    %c0_i32_0 = arith.constant 0 : i32
    %c0_i32_1 = arith.constant 0 : i32
    return %c0_i32, %c0_i32_0 : i32, i32
  }
  func.func @transform_2(%arg0: i32) -> (i32, i32) {
    %c0_i32 = arith.constant 0 : i32
    %c0_i32_0 = arith.constant 0 : i32
    %c0_i32_1 = arith.constant 0 : i32
    return %c0_i32, %c0_i32_0 : i32, i32
  }
  func.func @transform_3(%arg0: i32) -> (i32, i32) {
    %c0_i32 = arith.constant 0 : i32
    %c0_i32_0 = arith.constant 0 : i32
    %c0_i32_1 = arith.constant 0 : i32
    return %c0_i32, %c0_i32_0 : i32, i32
  }
  func.func @transform_4(%arg0: i32) -> (i32, i32) {
    %c0_i32 = arith.constant 0 : i32
    %c0_i32_0 = arith.constant 0 : i32
    %c0_i32_1 = arith.constant 0 : i32
    return %c0_i32, %c0_i32_0 : i32, i32
  }
  func.func @transform_5(%arg0: i32) -> (i32, i32) {
    %c0_i32 = arith.constant 0 : i32
    %c0_i32_0 = arith.constant 0 : i32
    return %arg0, %c0_i32 : i32, i32
  }
}

</mosaic_0001>

<bundles_post_ra>
// kernel: tpu_custom_call.1
= control target key start
LH: loop header
LB: loop body
LE: loop exit
PB: predicated region body
PF: predicated region fallthrough
CT: control target
= control target key end

     0   :  { %vm28_vm0 = vcmask 261120   ;;  %s2756_s0 = inlined_call_operand.vmem [shape: f32[16,32], index: 0, kind: input, shape index: {}]   ;;  %s2757_s1 = inlined_call_operand.vmem [shape: f32[32,4], index: 1, kind: input, shape index: {}]   ;;  %s2758_s2 = inlined_call_operand.vmem [shape: f32[4,32], index: 2, kind: input, shape index: {}]   ;;  %s2759_s3 = inlined_call_operand.vmem [shape: f32[1,32], index: 3, kind: input, shape index: {}]   ;;  %s2760_s4 = inlined_call_operand.vmem [shape: f32[1,32], index: 4, kind: input, shape index: {}]   ;;  %s2761_s5 = inlined_call_operand.hbm [shape: f32[16,32], index: 5, kind: output, shape index: {}]  }
   0x1   :  { %v26_v0 = vld [vmem:[%s2757_s1 + $0x18] sm:$0xff]  ;;  %v25_v1 = vld [vmem:[%s2757_s1 + $0x10] sm:$0xff]  ;;  %v24_v2 = vld [vmem:[%s2757_s1 + $0x8] sm:$0xff] }
   0x2   :  { %v2515_v3 = vand.u32 4294901760, %v26_v0  ;;  %v2517_v4 = vand.u32 4294901760, %v25_v1  ;;  %v2519_v5 = vand.u32 4294901760, %v24_v2  ;;  %v23_v6 = vld [vmem:[%s2757_s1] sm:$0xff]  ;;  %v2532_v8 = vld [vmem:[%s2756_s0 + $0x8] sm:$0xff] }
   0x3   :  { %v2527_v7 = vld [vmem:[%s2756_s0] sm:$0xff]  ;;  %v2534_v9 = vand.u32 4294901760, %v23_v6  ;;  %v33_v11 = vsel %vm28_vm0, %v2532_v8, 0 }
   0x4   :  { %v30_v10 = vsel %vm28_vm0, %v2527_v7, 0 }
   0x5   :  { %10 = vsyncpa [#allocation3], 0  ;;  %2252 = vmatprep.subr.mxu0 %v2515_v3  ;;  %v2542_v12 = vsub.f32 %v26_v0, %v2515_v3  ;;  %v2544_v13 = vand.u32 4294901760, %v30_v10  ;;  %v2547_v14 = vsub.f32 %v25_v1, %v2517_v4  ;;  %v2549_v15 = vand.u32 4294901760, %v33_v11  ;;  %v27_v38 = vld [vmem:[%s2758_s2] sm:$0xf] }
   0x6   :  { %2253 = vmatpush3.msra.mxu0 %v2515_v3  ;;  %v2553_v16 = vsub.f32 %v24_v2, %v2519_v5  ;;  %v2556_v17 = vsub.f32 %v23_v6, %v2534_v9  ;;  %vm572_vm1 = vcmask 1043456   ;;  %vm565_vm2 = vcmask 31744   ;;  %s2473_s8 = smov [#allocation2]  }
   0x7   :  { %2254 = vmatprep.subr.mxu0 %v2517_v4  ;;  %v2560_v18 = vand.u32 4294901760, %v2542_v12  ;;  %v105_v19 = vsub.f32 %v30_v10, %v2544_v13  ;;  %v2564_v20 = vand.u32 4294901760, %v2547_v14  ;;  %v115_v21 = vsub.f32 %v33_v11, %v2549_v15  ;;  %2271 = vmatprep.mubr.f32.mxu1 %v2544_v13  ;;  %s2131_s9 = sshll.u32 %s2473_s8, 4  ;;  %s2132_s9 = int_to_ptr.vmem [resolvable:$true] %s2131_s9 }
   0x8   :  { %2255 = vmatpush3.msra.mxu0 %v2517_v4  ;;  %v2570_v22 = vand.u32 4294901760, %v2553_v16  ;;  %v2573_v23 = vand.u32 4294901760, %v2556_v17  ;;  %v574_v39 = vsel %vm572_vm1, %v27_v38, 0  ;;  %p2456_p1 = scmp.lt.s32.totalorder %s2132_s9, %s2132_s9 }
   0x9   :  { %2256 = vmatprep.subr.mxu0 %v2519_v5  ;;  %v152_v24 = vsub.f32 %v2542_v12, %v2560_v18  ;;  %v106_v25 = vand.u32 4294901760, %v105_v19  ;;  %v159_v26 = vsub.f32 %v2547_v14, %v2564_v20  ;;  %v116_v27 = vand.u32 4294901760, %v115_v21 }
   0xa   :  { %2257 = vmatpush3.msra.mxu0 %v2519_v5  ;;  %v166_v28 = vsub.f32 %v2553_v16, %v2570_v22  ;;  %v173_v29 = vsub.f32 %v2556_v17, %v2573_v23  ;;  %v2643_v40 = vand.u32 4294901760, %v574_v39 }
   0xb   :  { %2258 = vmatprep.subr.mxu0 %v2534_v9  ;;  %v2586_v30 = vand.u32 4294901760, %v152_v24  ;;  %v107_v31 = vsub.f32 %v105_v19, %v106_v25  ;;  %v2588_v32 = vand.u32 4294901760, %v159_v26  ;;  %v117_v33 = vsub.f32 %v115_v21, %v116_v27 }
   0xc   :  { %2259 = vmatpush3.msra.mxu0 %v2534_v9  ;;  %v2593_v36 = vand.u32 4294901760, %v166_v28  ;;  %v2597_v37 = vand.u32 4294901760, %v173_v29  ;;  %v2646_v41 = vsub.f32 %v574_v39, %v2643_v40 }
   0xd   :  { %2263 = vmatprep.subr.mxu1 %v2586_v30  ;;  %v108_v34 = vand.u32 4294901760, %v107_v31  ;;  %2274 = vmatprep.subr.mxu0 %v2542_v12  ;;  %v118_v35 = vand.u32 4294901760, %v117_v33 }
   0xe   :  { %2264 = vmatpush3.msra.mxu1 %v2586_v30  ;;  %v2651_v42 = vand.u32 4294901760, %v2646_v41 }
   0xf   :  { %2260 = vmatprep.mubr.f32.mxu0 %v108_v34  ;;  %2265 = vmatprep.subr.mxu1 %v2588_v32 }
  0x10   :  { %2261 = vmatmul.mubr.f32.vlgmr.msra.gmra.mxu0 %v118_v35  ;;  %2266 = vmatpush3.msra.mxu1 %v2588_v32  ;;  %v696_v43 = vsub.f32 %v2646_v41, %v2651_v42 }
  0x11   :  { %2275 = vmatpush3.msra.mxu0 %v2542_v12  ;;  %2267 = vmatprep.subr.mxu1 %v2593_v36 }
  0x12   :  { %2276 = vmatprep.subr.mxu0 %v2547_v14  ;;  %2268 = vmatpush3.msra.mxu1 %v2593_v36  ;;  %v2656_v44 = vand.u32 4294901760, %v696_v43 }
  0x13   :  { %2277 = vmatpush3.msra.mxu0 %v2547_v14  ;;  %2269 = vmatprep.subr.mxu1 %v2597_v37 }
  0x14   :  { %2278 = vmatprep.subr.mxu0 %v2553_v16  ;;  %2270 = vmatpush3.msra.mxu1 %v2597_v37 }
  0x15   :  { %2279 = vmatpush3.msra.mxu0 %v2553_v16  ;;  %2272 = vmatmul.mubr.f32.vlgmr.msra.gmra.mxu1 %v2549_v15 }
  0x16   :  { %2280 = vmatprep.subr.mxu0 %v2556_v17  ;;  %2285 = vmatprep.subr.mxu1 %v2515_v3 }
  0x17   :  { %2281 = vmatpush3.msra.mxu0 %v2556_v17  ;;  %2282 = vmatprep.mubr.f32.mxu0 %v105_v19 }
  0x18   :  { %2286 = vmatpush3.msra.mxu1 %v2515_v3  ;;  %2283 = vmatmul.mubr.f32.vlgmr.msra.gmra.mxu0 %v115_v21 }
  0x19   :  { %2287 = vmatprep.subr.mxu1 %v2517_v4  ;;  %2296 = vmatprep.subr.mxu0 %v2560_v18 }
  0x1a   :  { %2288 = vmatpush3.msra.mxu1 %v2517_v4  ;;  %2297 = vmatpush3.msra.mxu0 %v2560_v18 }
  0x1b   :  { %2289 = vmatprep.subr.mxu1 %v2519_v5  ;;  %2298 = vmatprep.subr.mxu0 %v2564_v20 }
  0x1c   :  { %2290 = vmatpush3.msra.mxu1 %v2519_v5  ;;  %2299 = vmatpush3.msra.mxu0 %v2564_v20 }
  0x1d   :  { %2291 = vmatprep.subr.mxu1 %v2534_v9  ;;  %2300 = vmatprep.subr.mxu0 %v2570_v22 }
  0x1e   :  { %2292 = vmatpush3.msra.mxu1 %v2534_v9  ;;  %2293 = vmatprep.mubr.f32.mxu1 %v106_v25 }
  0x1f   :  { %2301 = vmatpush3.msra.mxu0 %v2570_v22  ;;  %2294 = vmatmul.mubr.f32.vlgmr.msra.gmra.mxu1 %v116_v27 }
  0x20   :  { %2302 = vmatprep.subr.mxu0 %v2573_v23  ;;  %2307 = vmatprep.subr.mxu1 %v2515_v3 }
  0x21   :  { %2303 = vmatpush3.msra.mxu0 %v2573_v23  ;;  %2304 = vmatprep.mubr.f32.mxu0 %v2544_v13 }
  0x22   :  { %2308 = vmatpush3.msra.mxu1 %v2515_v3  ;;  %2305 = vmatmul.mubr.f32.vlgmr.msra.gmra.mxu0 %v2549_v15 }
  0x23   :  { %2309 = vmatprep.subr.mxu1 %v2517_v4  ;;  %2315 = vmatprep.mubr.f32.mxu1 %v2544_v13 }
  0x24   :  { %2310 = vmatpush3.msra.mxu1 %v2517_v4  ;;  %2318 = vmatprep.subr.mxu0 %v2643_v40 }
  0x25   :  { %2311 = vmatprep.subr.mxu1 %v2519_v5  ;;  %2319 = vmatpush3.msra.mxu0 %v2643_v40 }
  0x26   :  { %2312 = vmatpush3.msra.mxu1 %v2519_v5  ;;  %2328 = vmatprep.subr.mxu0 %v2646_v41 }
  0x27   :  { %2313 = vmatprep.subr.mxu1 %v2534_v9 }
  0x28   :  { %2314 = vmatpush3.msra.mxu1 %v2534_v9 }
  0x29   :  { %2316 = vmatmul.mubr.f32.vlgmr.msra.gmra.mxu1 %v2549_v15  ;;  %2323 = vmatprep.subr.mxu1 %v2656_v44 }
  0x2a   :  { %2324 = vmatpush3.msra.mxu1 %v2656_v44 }
  0x2b   :  { %2333 = vmatprep.subr.mxu1 %v2643_v40 }
  0xd0   :  { %v2262_v45 = vpop.f32.mrf.mxu0 }
  0xd2   :  { %v110_v46 = vpop.f32.mrf.mxu0 }
  0xd5   :  { %v2273_v47 = vpop.f32.mrf.mxu1 }
  0xd6   :  { %v218_v50 = vadd.f32 %v2273_v47, %v2262_v45 }
  0xd7   :  { %v211_v48 = vpop.f32.mrf.mxu1 }
  0xd8   :  { %v2284_v49 = vpop.f32.mrf.mxu0  ;;  %v212_v52 = vadd.f32 %v211_v48, %v110_v46 }
  0xd9   :  { %v305_v54 = vadd.f32 %v2284_v49, %v218_v50 }
  0xda   :  { %v297_v53 = vpop.f32.mrf.mxu0 }
  0xdb   :  { %v298_v57 = vadd.f32 %v297_v53, %v212_v52 }
  0xdf   :  { %v2295_v51 = vpop.f32.mrf.mxu1 }
  0xe0   :  { %v390_v58 = vadd.f32 %v2295_v51, %v305_v54 }
  0xe1   :  { %v381_v55 = vpop.f32.mrf.mxu1 }
  0xe2   :  { %v2306_v56 = vpop.f32.mrf.mxu0  ;;  %v382_v59 = vadd.f32 %v381_v55, %v298_v57 }
  0xe3   :  { %v479_v61 = vadd.f32 %v2306_v56, %v390_v58 }
  0xe4   :  { %v472_v60 = vpop.f32.mrf.mxu0 }
  0xe5   :  { %v473_v63 = vadd.f32 %v472_v60, %v382_v59 }
  0xe9   :  { %v2317_v62 = vpop.f32.mrf.mxu1 }
  0xea   :  { %v560_v0 = vadd.f32 %v2317_v62, %v479_v61 }
  0xeb   :  { %v553_v1 = vpop.f32.mrf.mxu1 }
  0xec   :  { %v564_v2 = vmul.f32 0.125, %v560_v0  ;;  %v554_v6 = vadd.f32 %v553_v1, %v473_v63 }
  0xee   :  { %v570_v10 = vsel %vm565_vm2, %v564_v2, 0  ;;  %v563_v11 = vmul.f32 0.125, %v554_v6 }
  0xef   :  { %v652_v13 = vand.u32 4294901760, %v570_v10 }
  0xf0   :  { %v567_v15 = vsel %vm565_vm2, %v563_v11, 0 }
  0xf1   :  { %v653_v19 = vsub.f32 %v570_v10, %v652_v13  ;;  %v642_v21 = vand.u32 4294901760, %v567_v15 }
  0xf3   :  { %v643_v24 = vsub.f32 %v567_v15, %v642_v21  ;;  %2325 = vmatprep.mubr.f32.mxu1 %v642_v21  ;;  %v654_v25 = vand.u32 4294901760, %v653_v19 }
  0xf4   :  { %2326 = vmatmul.mubr.f32.vlgmr.msra.gmra.mxu1 %v652_v13 }
  0xf5   :  { %2334 = vmatpush3.msra.mxu1 %v2643_v40  ;;  %v644_v26 = vand.u32 4294901760, %v643_v24  ;;  %v655_v27 = vsub.f32 %v653_v19, %v654_v25 }
  0xf6   :  { %2343 = vmatprep.subr.mxu1 %v2643_v40 }
  0xf7   :  { %2335 = vmatprep.mubr.f32.mxu1 %v644_v26  ;;  %v645_v28 = vsub.f32 %v643_v24, %v644_v26  ;;  %v656_v31 = vand.u32 4294901760, %v655_v27 }
  0xf8   :  { %2336 = vmatmul.mubr.f32.vlgmr.msra.gmra.mxu1 %v654_v25 }
  0xf9   :  { %2345 = vmatprep.mubr.f32.mxu1 %v642_v21  ;;  %v646_v29 = vand.u32 4294901760, %v645_v28  ;;  %2344 = vmatpush3.msra.mxu1 %v2643_v40 }
  0xfa   :  { %2359 = vmatprep.subr.mxu1 %v2586_v30 }
  0xfb   :  { %2320 = vmatprep.mubr.f32.mxu0 %v646_v29 }
  0xfc   :  { %2321 = vmatmul.mubr.f32.vlgmr.msra.gmra.mxu0 %v656_v31  ;;  %2346 = vmatmul.mubr.f32.vlgmr.msra.gmra.mxu1 %v652_v13 }
  0xfd   :  { %2329 = vmatpush3.msra.mxu0 %v2646_v41  ;;  %2330 = vmatprep.mubr.f32.mxu0 %v643_v24 }
  0xfe   :  { %2338 = vmatprep.subr.mxu0 %v2651_v42  ;;  %2360 = vmatpush3.msra.mxu1 %v2586_v30 }
  0xff   :  { %2361 = vmatprep.subr.mxu1 %v2588_v32 }
 0x100   :  { %2331 = vmatmul.mubr.f32.vlgmr.msra.gmra.mxu0 %v653_v19  ;;  %2362 = vmatpush3.msra.mxu1 %v2588_v32 }
 0x101   :  { %2339 = vmatpush3.msra.mxu0 %v2651_v42  ;;  %2340 = vmatprep.mubr.f32.mxu0 %v642_v21 }
 0x102   :  { %2363 = vmatprep.subr.mxu1 %v2593_v36  ;;  %2348 = vmatprep.subr.mxu0 %v2515_v3 }
 0x103   :  { %2364 = vmatpush3.msra.mxu1 %v2593_v36 }
 0x104   :  { %2341 = vmatmul.mubr.f32.vlgmr.msra.gmra.mxu0 %v652_v13  ;;  %2365 = vmatprep.subr.mxu1 %v2597_v37 }
 0x105   :  { %2366 = vmatpush3.msra.mxu1 %v2597_v37  ;;  %2349 = vmatpush3.msra.mxu0 %v2515_v3 }
 0x106   :  { %2381 = vmatprep.subr.mxu1 %v2515_v3  ;;  %2350 = vmatprep.subr.mxu0 %v2517_v4 }
 0x107   :  { %2351 = vmatpush3.msra.mxu0 %v2517_v4 }
 0x108   :  { %2352 = vmatprep.subr.mxu0 %v2519_v5 }
 0x109   :  { %2353 = vmatpush3.msra.mxu0 %v2519_v5 }
 0x10a   :  { %2354 = vmatprep.subr.mxu0 %v2534_v9 }
 0x10b   :  { %2355 = vmatpush3.msra.mxu0 %v2534_v9 }
 0x10c   :  { %2370 = vmatprep.subr.mxu0 %v2542_v12 }
 0x1b4   :  { %v2327_v30 = vpop.f32.mrf.mxu1 }
 0x1b6   :  { %v734_v32 = vpop.f32.mrf.mxu1 }
 0x1b8   :  { %v2337_v33 = vpop.f32.mrf.mxu1 }
 0x1ba   :  { %v895_v37 = vpop.f32.mrf.mxu1 }
 0x1bc   :  { %v2322_v34 = vpop.f32.mrf.mxu0  ;;  %v2347_v48 = vpop.f32.mrf.mxu1 }
 0x1bd   :  { %v741_v36 = vadd.f32 %v2327_v30, %v2322_v34 }
 0x1be   :  { %v648_v35 = vpop.f32.mrf.mxu0  ;;  %v1055_v55 = vpop.f32.mrf.mxu1 }
 0x1bf   :  { %v735_v39 = vadd.f32 %v734_v32, %v648_v35 }
 0x1c0   :  { %v2332_v38 = vpop.f32.mrf.mxu0 }
 0x1c1   :  { %v822_v43 = vadd.f32 %v2332_v38, %v741_v36 }
 0x1c2   :  { %v814_v45 = vpop.f32.mrf.mxu0 }
 0x1c3   :  { %v815_v46 = vadd.f32 %v814_v45, %v735_v39  ;;  %v904_v47 = vadd.f32 %v2337_v33, %v822_v43 }
 0x1c4   :  { %v2342_v49 = vpop.f32.mrf.mxu0 }
 0x1c5   :  { %v984_v50 = vadd.f32 %v2342_v49, %v904_v47  ;;  %v896_v51 = vadd.f32 %v895_v37, %v815_v46 }
 0x1c6   :  { %v977_v52 = vpop.f32.mrf.mxu0 }
 0x1c7   :  { %v1062_v53 = vadd.f32 %v2347_v48, %v984_v50  ;;  %v978_v54 = vadd.f32 %v977_v52, %v896_v51 }
 0x1c9   :  { %v2688_v56 = vsub.f32 %v2532_v8, %v1062_v53  ;;  %v1056_v57 = vadd.f32 %v1055_v55, %v978_v54 }
 0x1cb   :  { %v1068_v58 = vmul.f32 %v2688_v56, %v2688_v56  ;;  %v2693_v59 = vsub.f32 %v2527_v7, %v1056_v57 }
 0x1cd   :  { %v1067_v60 = vmul.f32 %v2693_v59, %v2693_v59  ;;  %v1073_v61 = vsel %vm28_vm0, %v1068_v58, 0 }
 0x1ce   :  { %v1154_v62 = vand.u32 4294901760, %v1073_v61 }
 0x1cf   :  { %v1070_v63 = vsel %vm28_vm0, %v1067_v60, 0 }
 0x1d0   :  { %v1144_v0 = vand.u32 4294901760, %v1070_v63  ;;  %v1155_v1 = vsub.f32 %v1073_v61, %v1154_v62 }
 0x1d2   :  { %2367 = vmatprep.mubr.f32.mxu1 %v1144_v0  ;;  %v1145_v8 = vsub.f32 %v1070_v63, %v1144_v0  ;;  %v1156_v2 = vand.u32 4294901760, %v1155_v1 }
 0x1d3   :  { %2368 = vmatmul.mubr.f32.vlgmr.msra.gmra.mxu1 %v1154_v62 }
 0x1d4   :  { %2382 = vmatpush3.msra.mxu1 %v2515_v3  ;;  %v1146_v6 = vand.u32 4294901760, %v1145_v8  ;;  %v1157_v10 = vsub.f32 %v1155_v1, %v1156_v2 }
 0x1d5   :  { %2383 = vmatprep.subr.mxu1 %v2517_v4 }
 0x1d6   :  { %2384 = vmatpush3.msra.mxu1 %v2517_v4  ;;  %2389 = vmatprep.mubr.f32.mxu1 %v1146_v6  ;;  %v1147_v7 = vsub.f32 %v1145_v8, %v1146_v6  ;;  %v1158_v13 = vand.u32 4294901760, %v1157_v10 }
 0x1d7   :  { %2385 = vmatprep.subr.mxu1 %v2519_v5 }
 0x1d8   :  { %2386 = vmatpush3.msra.mxu1 %v2519_v5  ;;  %v1148_v11 = vand.u32 4294901760, %v1147_v7 }
 0x1d9   :  { %2387 = vmatprep.subr.mxu1 %v2534_v9 }
 0x1da   :  { %2388 = vmatpush3.msra.mxu1 %v2534_v9  ;;  %2356 = vmatprep.mubr.f32.mxu0 %v1148_v11 }
 0x1db   :  { %2390 = vmatmul.mubr.f32.vlgmr.msra.gmra.mxu1 %v1156_v2  ;;  %2403 = vmatprep.subr.mxu1 %v2515_v3 }
 0x1dc   :  { %2357 = vmatmul.mubr.f32.vlgmr.msra.gmra.mxu0 %v1158_v13  ;;  %2404 = vmatpush3.msra.mxu1 %v2515_v3  ;;  %v2142_v13 = vld [vmem:[%s2759_s3] ss:$0 sm:$0xff]  ;;  %s2451_s3 = scalar_lea.vmem %s2132_s9, 256 }
 0x1dd   :  { %2371 = vmatpush3.msra.mxu0 %v2542_v12  ;;  %2411 = vmatprep.mubr.f32.mxu1 %v1144_v0  ;;  %p2452_p0 = scmp.ne.s32.totalorder %s2132_s9, %s2451_s3  ;;  %p2457_p2 = scmp.lt.s32.totalorder %s2451_s3, %s2451_s3 }
 0x1de   :  { %2372 = vmatprep.subr.mxu0 %v2547_v14  ;;  %2378 = vmatprep.mubr.f32.mxu0 %v1145_v8 }
 0x1df   :  { %2405 = vmatprep.subr.mxu1 %v2517_v4  ;;  %2373 = vmatpush3.msra.mxu0 %v2547_v14  ;;  %p2458_p3 = por %p2457_p2, %p2456_p1 }
 0x1e0   :  { %2406 = vmatpush3.msra.mxu1 %v2517_v4  ;;  %2374 = vmatprep.subr.mxu0 %v2553_v16 }
 0x1e1   :  { %2407 = vmatprep.subr.mxu1 %v2519_v5  ;;  %2375 = vmatpush3.msra.mxu0 %v2553_v16  ;;  %p2459_p4 = pnand %p2458_p3, %p2452_p0 }
 0x1e2   :  { %2408 = vmatpush3.msra.mxu1 %v2519_v5  ;;  %2376 = vmatprep.subr.mxu0 %v2556_v17 }
 0x1e3   :  { %2409 = vmatprep.subr.mxu1 %v2534_v9  ;;  %2377 = vmatpush3.msra.mxu0 %v2556_v17 }
 0x1e4   :  { %2410 = vmatpush3.msra.mxu1 %v2534_v9  ;;  %2379 = vmatmul.mubr.f32.vlgmr.msra.gmra.mxu0 %v1155_v1 }
 0x1e5   :  { %2392 = vmatprep.subr.mxu0 %v2560_v18  ;;  %2412 = vmatmul.mubr.f32.vlgmr.msra.gmra.mxu1 %v1154_v62 }
 0x1e6   :  { %2393 = vmatpush3.msra.mxu0 %v2560_v18  ;;  %2400 = vmatprep.mubr.f32.mxu0 %v1144_v0 }
 0x1e7   :  { %2394 = vmatprep.subr.mxu0 %v2564_v20  ;;  %2419 = vmatprep.subr.mxu1 %v2656_v44 }
 0x1e8   :  { %2395 = vmatpush3.msra.mxu0 %v2564_v20  ;;  %2420 = vmatpush3.msra.mxu1 %v2656_v44 }
 0x1e9   :  { %2396 = vmatprep.subr.mxu0 %v2570_v22  ;;  %2429 = vmatprep.subr.mxu1 %v2643_v40 }
 0x1ea   :  { %2397 = vmatpush3.msra.mxu0 %v2570_v22 }
 0x1eb   :  { %2398 = vmatprep.subr.mxu0 %v2573_v23 }
 0x1ec   :  { %2399 = vmatpush3.msra.mxu0 %v2573_v23 }
 0x1ed   :  { %2401 = vmatmul.mubr.f32.vlgmr.msra.gmra.mxu0 %v1154_v62  ;;  %2414 = vmatprep.subr.mxu0 %v2643_v40 }
 0x1ee   :  { %2415 = vmatpush3.msra.mxu0 %v2643_v40 }
 0x1ef   :  { %2424 = vmatprep.subr.mxu0 %v2646_v41 }
 0x293   :  { %v2369_v4 = vpop.f32.mrf.mxu1 }
 0x295   :  { %v1251_v12 = vpop.f32.mrf.mxu1 }
 0x29b   :  { %v2391_v16 = vpop.f32.mrf.mxu1 }
 0x29c   :  { %v2358_v3 = vpop.f32.mrf.mxu0 }
 0x29d   :  { %v1258_v14 = vadd.f32 %v2369_v4, %v2358_v3  ;;  %v1421_v44 = vpop.f32.mrf.mxu1 }
 0x29e   :  { %v1150_v5 = vpop.f32.mrf.mxu0 }
 0x29f   :  { %v1252_v18 = vadd.f32 %v1251_v12, %v1150_v5  ;;  %v2143_v5 = vld [vmem:[%s2760_s4] ss:$0 sm:$0xff] }
 0x2a4   :  { %v2380_v9 = vpop.f32.mrf.mxu0 }
 0x2a5   :  { %v1345_v20 = vadd.f32 %v2380_v9, %v1258_v14  ;;  %v2413_v15 = vpop.f32.mrf.mxu1 }
 0x2a6   :  { %v1337_v17 = vpop.f32.mrf.mxu0 }
 0x2a7   :  { %v1338_v22 = vadd.f32 %v1337_v17, %v1252_v18  ;;  %v1430_v23 = vadd.f32 %v2391_v16, %v1345_v20  ;;  %v1593_v28 = vpop.f32.mrf.mxu1 }
 0x2a9   :  { %v1422_v24 = vadd.f32 %v1421_v44, %v1338_v22 }
 0x2ad   :  { %v2402_v19 = vpop.f32.mrf.mxu0 }
 0x2ae   :  { %v1519_v21 = vadd.f32 %v2402_v19, %v1430_v23 }
 0x2af   :  { %v1512_v25 = vpop.f32.mrf.mxu0 }
 0x2b0   :  { %v1600_v26 = vadd.f32 %v2413_v15, %v1519_v21  ;;  %v1513_v27 = vadd.f32 %v1512_v25, %v1422_v24 }
 0x2b2   :  { %v1604_v29 = vmul.f32 0.125, %v1600_v26  ;;  %v1594_v31 = vadd.f32 %v1593_v28, %v1513_v27 }
 0x2b4   :  { %v1606_v30 = vadd.f32 1e-05, %v1604_v29  ;;  %v1603_v32 = vmul.f32 0.125, %v1594_v31 }
 0x2b6   :  { %2447 = vrsqrt.f32 %v1606_v30  ;;  %v1605_v33 = vadd.f32 1e-05, %v1603_v32 }
 0x2b8   :  { %2449 = vrsqrt.f32 %v1605_v33 }
 0x2c3   :  { %v2448_v34 = vpop.eup %2447 }
 0x2c4   :  { %v1613_v35 = vsel %vm565_vm2, %v2448_v34, 0 }
 0x2c5   :  { %v2450_v36 = vpop.eup %2449  ;;  %v1691_v37 = vand.u32 4294901760, %v1613_v35 }
 0x2c6   :  { %v1610_v38 = vsel %vm565_vm2, %v2450_v36, 0 }
 0x2c7   :  { %v1681_v39 = vand.u32 4294901760, %v1610_v38  ;;  %v1692_v43 = vsub.f32 %v1613_v35, %v1691_v37 }
 0x2c9   :  { %2421 = vmatprep.mubr.f32.mxu1 %v1681_v39  ;;  %v1682_v45 = vsub.f32 %v1610_v38, %v1681_v39  ;;  %v1693_v46 = vand.u32 4294901760, %v1692_v43 }
 0x2ca   :  { %2422 = vmatmul.mubr.f32.vlgmr.msra.gmra.mxu1 %v1691_v37 }
 0x2cb   :  { %2430 = vmatpush3.msra.mxu1 %v2643_v40  ;;  %v1683_v47 = vand.u32 4294901760, %v1682_v45  ;;  %v1694_v48 = vsub.f32 %v1692_v43, %v1693_v46 }
 0x2cc   :  { %2439 = vmatprep.subr.mxu1 %v2643_v40 }
 0x2cd   :  { %2431 = vmatprep.mubr.f32.mxu1 %v1683_v47  ;;  %v1684_v49 = vsub.f32 %v1682_v45, %v1683_v47  ;;  %v1695_v51 = vand.u32 4294901760, %v1694_v48 }
 0x2ce   :  { %2432 = vmatmul.mubr.f32.vlgmr.msra.gmra.mxu1 %v1693_v46 }
 0x2cf   :  { %2441 = vmatprep.mubr.f32.mxu1 %v1681_v39  ;;  %v1685_v50 = vand.u32 4294901760, %v1684_v49  ;;  %2440 = vmatpush3.msra.mxu1 %v2643_v40 }
 0x2d1   :  { %2416 = vmatprep.mubr.f32.mxu0 %v1685_v50 }
 0x2d2   :  { %2417 = vmatmul.mubr.f32.vlgmr.msra.gmra.mxu0 %v1695_v51  ;;  %2442 = vmatmul.mubr.f32.vlgmr.msra.gmra.mxu1 %v1691_v37 }
 0x2d3   :  { %2425 = vmatpush3.msra.mxu0 %v2646_v41  ;;  %2426 = vmatprep.mubr.f32.mxu0 %v1682_v45 }
 0x2d4   :  { %2434 = vmatprep.subr.mxu0 %v2651_v42 }
 0x2d6   :  { %2427 = vmatmul.mubr.f32.vlgmr.msra.gmra.mxu0 %v1692_v43 }
 0x2d7   :  { %2435 = vmatpush3.msra.mxu0 %v2651_v42  ;;  %2436 = vmatprep.mubr.f32.mxu0 %v1681_v39 }
 0x2da   :  { %2437 = vmatmul.mubr.f32.vlgmr.msra.gmra.mxu0 %v1691_v37 }
 0x38a   :  { %v2423_v52 = vpop.f32.mrf.mxu1 }
 0x38c   :  { %v1773_v53 = vpop.f32.mrf.mxu1 }
 0x38e   :  { %v2433_v54 = vpop.f32.mrf.mxu1 }
 0x390   :  { %v1934_v58 = vpop.f32.mrf.mxu1 }
 0x392   :  { %v2418_v55 = vpop.f32.mrf.mxu0  ;;  %v2443_v1 = vpop.f32.mrf.mxu1 }
 0x393   :  { %v1780_v40 = vadd.f32 %v2423_v52, %v2418_v55 }
 0x394   :  { %v1687_v57 = vpop.f32.mrf.mxu0  ;;  %v2094_v11 = vpop.f32.mrf.mxu1 }
 0x395   :  { %v1774_v61 = vadd.f32 %v1773_v53, %v1687_v57 }
 0x396   :  { %v2428_v60 = vpop.f32.mrf.mxu0 }
 0x397   :  { %v1861_v62 = vadd.f32 %v2428_v60, %v1780_v40 }
 0x398   :  { %v1853_v63 = vpop.f32.mrf.mxu0 }
 0x399   :  { %v1854_v41 = vadd.f32 %v1853_v63, %v1774_v61  ;;  %v1943_v0 = vadd.f32 %v2433_v54, %v1861_v62 }
 0x39a   :  { %v2438_v8 = vpop.f32.mrf.mxu0 }
 0x39b   :  { %v2023_v2 = vadd.f32 %v2438_v8, %v1943_v0  ;;  %v1935_v6 = vadd.f32 %v1934_v58, %v1854_v41 }
 0x39c   :  { %v2016_v42 = vpop.f32.mrf.mxu0 }
 0x39d   :  { %v2101_v7 = vadd.f32 %v2443_v1, %v2023_v2  ;;  %v2017_v10 = vadd.f32 %v2016_v42, %v1935_v6 }
 0x39f   :  { %v2105_v3 = vmul.f32 %v2101_v7, %v2688_v56  ;;  %v2095_v4 = vadd.f32 %v2094_v11, %v2017_v10 }
 0x3a1   :  { %v2114_v9 = vmul.f32 %v2142_v13, %v2105_v3  ;;  %v2104_v12 = vmul.f32 %v2095_v4, %v2693_v59 }
 0x3a3   :  { %v2123_v14 = vadd.f32 %v2143_v5, %v2114_v9  ;;  %v2113_v16 = vmul.f32 %v2142_v13, %v2104_v12 }
 0x3a5   :  { %2125 = vst.msk [vmem:[#allocation2 + $0x8] sm:$0xff] %vm28_vm0, %v2123_v14  ;;  %v2122_v17 = vadd.f32 %v2143_v5, %v2113_v16 }
 0x3a7   :  { %2124 = vst.msk [vmem:[#allocation2] sm:$0xff] %vm28_vm0, %v2122_v17 }
 0x3a8   :  { %2462 = shalt.err (!%p2459_p4)
}
 0x3a9   :  { %s2474_s4 = smov 128   ;;  %s2475_s10 = smov 8  }
 0x3aa   :  { %2137 = dma.vmem_to_hbm [thread:$0]  %s2132_s9, 256, %s2761_s5, [#allocation3], %s2474_s4, %s2474_s4, %s2475_s10  }
 0x3ab   :  { %2471 = dma.done.wait [#allocation3], 256  }
 0x3ac   :  { %2472 = vsyncadd [#allocation3], 4294967040 }
 0x3ad   :  { %2141 = vsyncpa [#allocation3], 1 }

</bundles_post_ra>
